<compile_context>
chip_gen: v7x
topology: tpu7x:2x2x1
jax: 0.10.0
libtpu: 0.0.40
codegen_flags: <defaults>
</compile_context>

<pallas_src>
import functools

import jax
import jax.numpy as jnp
from jax.experimental import pallas as pl
from jax.experimental.pallas import tpu as pltpu


def _round_up(x: int, m: int) -> int:
    return ((x + m - 1) // m) * m


def _moments_kernel(tgt_ref, sum_ref, sumsq_ref, *,
                    n_t: int, tile_n: int, tiles_per_core: int, need_mask: bool):
    """Accumulate per-column (sublane-partial) first/second moments of target rows.

    tgt_ref   : (tile_n, K) target feature row tile (input dtype), VMEM
    sum_ref   : (8, K)  per-sublane partial sum(x),   f32, output-resident accumulator
    sumsq_ref : (8, K)  per-sublane partial sum(x^2), f32, output-resident accumulator
    """
    c = pl.program_id(0)   # core split (parallel axis)
    i = pl.program_id(1)   # row-tile index within this split (arbitrary axis)

    @pl.when(i == 0)
    def _():
        sum_ref[...] = jnp.zeros_like(sum_ref)
        sumsq_ref[...] = jnp.zeros_like(sumsq_ref)

    x = tgt_ref[...].astype(jnp.float32)                 # (tile_n, K)

    if need_mask:
        # Unclamped global tile index -> number of valid rows in this tile
        # (<= 0 for fully out-of-range tiles, which then contribute nothing).
        t = c * tiles_per_core + i
        rows_remaining = n_t - t * tile_n
        row_idx = jax.lax.broadcasted_iota(jnp.int32, (tile_n, 1), 0)
        x = jnp.where(row_idx < rows_remaining, x, 0.0)

    k = x.shape[1]
    # Split only the major dim (layout-preserving); summing over the leading axis
    # is pure VALU vreg adds — the 8->1 cross-sublane collapse is deferred to the
    # wrapper finalize, keeping the XLU out of the hot loop.
    x3 = x.reshape(tile_n // 8, 8, k)
    sum_ref[...] += jnp.sum(x3, axis=0)
    sumsq_ref[...] += jnp.sum(x3 * x3, axis=0)


def weighted_coral_loss(source_features_proj,
                        target_features_proj,
                        source_eigenvalues,
                        dimension_weights,
                        epsilon: float = 1e-5,
                        reduction: str = "mean",
                        vmem_tile_bytes: int = 8 * 1024 * 1024):
    if reduction not in ("mean", "sum", "none"):
        raise ValueError(f"Reduction method '{reduction}' not supported.")

    if source_features_proj.ndim == 1:
        source_features_proj = source_features_proj[None, :]
    if target_features_proj.ndim == 1:
        target_features_proj = target_features_proj[None, :]

    k = source_features_proj.shape[1]
    if target_features_proj.shape[1] != k:
        raise ValueError("Source and target projected features must have the "
                         "same feature dimension K.")
    if source_eigenvalues.shape != (k,) or dimension_weights.shape != (k,):
        raise ValueError(f"source_eigenvalues and dimension_weights must have "
                         f"shape ({k},).")

    n_t = int(target_features_proj.shape[0])
    w = dimension_weights.astype(jnp.float32)
    lam = source_eigenvalues.astype(jnp.float32)

    if n_t <= 1:
        # PyTorch branch: target covariance is all zeros (no eps added), so
        # loss = ||diag(w * lambda)||_F^2. No kernel needed.
        loss = jnp.sum((w * lam) ** 2)
    else:
        num_splits = 2   # both TensorCores on v7x; harmless serial split on v5e/v6e
        itemsize = jnp.dtype(target_features_proj.dtype).itemsize

        # VMEM/K-aware row tile: ~vmem_tile_bytes per input buffer, multiple of 8,
        # capped at the (rounded-up) per-core row count.
        rows_fit = max(8, (int(vmem_tile_bytes) // max(1, k * itemsize)) // 8 * 8)
        rows_per_core = _round_up(max(1, pl.cdiv(n_t, num_splits)), 8)
        tile_n = max(8, min(rows_fit, rows_per_core))

        total_tiles = pl.cdiv(n_t, tile_n)
        tiles_per_core = pl.cdiv(total_tiles, num_splits)
        need_mask = (tiles_per_core * num_splits * tile_n) != n_t
        last_tile = total_tiles - 1

        def tgt_index(c, i):
            # Clamp fully out-of-range tile indices back in range; their rows are
            # masked to zero inside the kernel.
            return (jnp.minimum(c * tiles_per_core + i, last_tile), 0)

        kernel = functools.partial(
            _moments_kernel, n_t=n_t, tile_n=tile_n,
            tiles_per_core=tiles_per_core, need_mask=need_mask)

        sum_out, sumsq_out = pl.pallas_call(
            kernel,
            out_shape=(jax.ShapeDtypeStruct((num_splits * 8, k), jnp.float32),
                       jax.ShapeDtypeStruct((num_splits * 8, k), jnp.float32)),
            grid_spec=pltpu.PrefetchScalarGridSpec(
                num_scalar_prefetch=0,
                grid=(num_splits, tiles_per_core),
                in_specs=[
                    # Stream target rows in their native dtype; cast to f32 in-kernel.
                    pl.BlockSpec((tile_n, k), tgt_index),
                ],
                out_specs=[
                    pl.BlockSpec((8, k), lambda c, i: (c, 0)),
                    pl.BlockSpec((8, k), lambda c, i: (c, 0)),
                ],
            ),
            compiler_params=pltpu.CompilerParams(
                dimension_semantics=("parallel", "arbitrary"),
                vmem_limit_bytes=32 * 1024 * 1024),
        )(target_features_proj)

        # Tiny K-element finalize in the wrapper: combine core/sublane partials,
        # form the covariance diagonal, and reduce to the scalar loss.
        sum_k = jnp.sum(sum_out, axis=0)       # (K,)
        sumsq_k = jnp.sum(sumsq_out, axis=0)   # (K,)
        diag_cov = (sumsq_k - sum_k * sum_k * (1.0 / n_t)) * (1.0 / (n_t - 1)) \
            + jnp.float32(epsilon)
        diff = w * (lam - diag_cov)
        loss = jnp.sum(diff * diff)

    if reduction in ("mean", "sum"):
        return loss
    return loss[None]   # 'none' -> shape (1,)


def _reference(target_features_proj, source_eigenvalues, dimension_weights,
               epsilon=1e-5):
    """Pure-JAX reference mirroring the PyTorch forward."""
    n_t, k = target_features_proj.shape
    if n_t <= 1:
        cov_t = jnp.zeros((k, k), jnp.float32)
    else:
        mean_t = jnp.mean(target_features_proj, axis=0, keepdims=True)
        centered = target_features_proj - mean_t
        cov_t = centered.T @ centered / (n_t - 1) + jnp.eye(k) * epsilon
    w_src = jnp.diag(dimension_weights * source_eigenvalues)
    w_tgt = jnp.diag(dimension_weights) * cov_t
    diff = w_src - w_tgt
    return jnp.sum(diff * diff)


if __name__ == "__main__":
    key = jax.random.PRNGKey(0)
    k1, k2, k3, k4 = jax.random.split(key, 4)

    # Case 1: small, aligned shapes.
    N_S, N_T, K = 8, 8, 32
    source_features_proj = jax.random.normal(k1, (N_S, K), dtype=jnp.float32)
    target_features_proj = jax.random.normal(k2, (N_T, K), dtype=jnp.float32)
    source_eigenvalues = jnp.abs(jax.random.normal(k3, (K,), dtype=jnp.float32)) + 0.1
    dimension_weights = jax.nn.softmax(jax.random.normal(k4, (K,), dtype=jnp.float32)) * K

    loss = weighted_coral_loss(source_features_proj, target_features_proj,
                               source_eigenvalues, dimension_weights,
                               epsilon=1e-5, reduction="mean")
    loss = jax.block_until_ready(loss)
    ref = _reference(target_features_proj, source_eigenvalues,
                     dimension_weights, epsilon=1e-5)
    assert jnp.allclose(loss, ref, rtol=2e-4, atol=1e-6), (loss, ref)

    # Case 2: ragged rows / non-lane-aligned K to exercise the in-kernel mask.
    N_T2, K2 = 13, 40
    tgt2 = jax.random.normal(k2, (N_T2, K2), dtype=jnp.float32)
    src2 = jax.random.normal(k1, (4, K2), dtype=jnp.float32)
    eig2 = jnp.abs(jax.random.normal(k3, (K2,), dtype=jnp.float32)) + 0.1
    w2 = jax.nn.softmax(jax.random.normal(k4, (K2,), dtype=jnp.float32)) * K2
    loss2 = weighted_coral_loss(src2, tgt2, eig2, w2, epsilon=1e-5, reduction="sum")
    loss2 = jax.block_until_ready(loss2)
    ref2 = _reference(tgt2, eig2, w2, epsilon=1e-5)
    assert jnp.allclose(loss2, ref2, rtol=2e-4, atol=1e-6), (loss2, ref2)

    print("KERNEL_OK")
</pallas_src>

<mosaic_0001>
module attributes {stable_mosaic.version = 11 : i64} {
  func.func @_moments_kernel(%arg0: i32, %arg1: i32, %arg2: memref<8x32xf32, #tpu.memory_space<vmem>>, %arg3: memref<8x32xf32, #tpu.memory_space<vmem>>, %arg4: memref<8x32xf32, #tpu.memory_space<vmem>>) attributes {dimension_semantics = [#tpu.dimension_semantics<parallel>, #tpu.dimension_semantics<arbitrary>], iteration_bounds = array<i64: 2, 1>, scalar_prefetch = 0 : i64, scratch_operands = 0 : i64, tpu.core_type = #tpu.core_type<tc>, window_params = [{transform_indices = @transform_0, window_bounds = array<i64: 8, 32>}, {transform_indices = @transform_1, window_bounds = array<i64: 8, 32>}, {transform_indices = @transform_2, window_bounds = array<i64: 8, 32>}]} {
    %c0_i32 = arith.constant 0 : i32
    %0 = arith.cmpi eq, %arg1, %c0_i32 : i32
    %1 = arith.extui %0 : i1 to i32
    %c0_i32_0 = arith.constant 0 : i32
    %2 = arith.cmpi ne, %1, %c0_i32_0 : i32
    scf.if %2 {
      %cst_13 = arith.constant 0.000000e+00 : f32
      %25 = vector.broadcast %cst_13 : f32 to vector<8x32xf32>
      %c0_14 = arith.constant 0 : index
      %c0_15 = arith.constant 0 : index
      %26 = vector.load %arg3[%c0_14, %c0_15] : memref<8x32xf32, #tpu.memory_space<vmem>>, vector<8x32xf32>
      tpu.vector_store %arg3[%c0_14, %c0_15], %25 {strides = array<i32>} : memref<8x32xf32, #tpu.memory_space<vmem>>, vector<8x32xf32>,
      %cst_16 = arith.constant 0.000000e+00 : f32
      %27 = vector.broadcast %cst_16 : f32 to vector<8x32xf32>
      %c0_17 = arith.constant 0 : index
      %c0_18 = arith.constant 0 : index
      %28 = vector.load %arg4[%c0_17, %c0_18] : memref<8x32xf32, #tpu.memory_space<vmem>>, vector<8x32xf32>
      tpu.vector_store %arg4[%c0_17, %c0_18], %27 {strides = array<i32>} : memref<8x32xf32, #tpu.memory_space<vmem>>, vector<8x32xf32>,
    } else {
    }
    %c0 = arith.constant 0 : index
    %c0_1 = arith.constant 0 : index
    %3 = vector.load %arg2[%c0, %c0_1] : memref<8x32xf32, #tpu.memory_space<vmem>>, vector<8x32xf32>
    %c1_i32 = arith.constant 1 : i32
    %4 = arith.muli %arg0, %c1_i32 : i32
    %5 = arith.addi %4, %arg1 : i32
    %c8_i32 = arith.constant 8 : i32
    %6 = arith.muli %5, %c8_i32 : i32
    %c8_i32_2 = arith.constant 8 : i32
    %7 = arith.subi %c8_i32_2, %6 : i32
    %8 = tpu.iota {dimensions = array<i32: 0>} : vector<8x1xi32>
    %9 = vector.broadcast %7 : i32 to vector<8x1xi32>
    %10 = arith.cmpi slt, %8, %9 : vector<8x1xi32>
    %cst = arith.constant 0.000000e+00 : f32
    %11 = vector.shape_cast %10 : vector<8x1xi1> to vector<8x1xi1>
    %12 = vector.broadcast %11 : vector<8x1xi1> to vector<8x32xi1>
    %13 = vector.broadcast %cst : f32 to vector<8x32xf32>
    %14 = arith.select %12, %3, %13 : vector<8x32xi1>, vector<8x32xf32>
    %15 = vector.shape_cast %14 : vector<8x32xf32> to vector<1x8x32xf32>
    %c0_3 = arith.constant 0 : index
    %c0_4 = arith.constant 0 : index
    %16 = vector.load %arg3[%c0_3, %c0_4] : memref<8x32xf32, #tpu.memory_space<vmem>>, vector<8x32xf32>
    %cst_5 = arith.constant dense<0.000000e+00> : vector<8x32xf32>
    %17 = vector.multi_reduction <add>, %15, %cst_5 [0] : vector<1x8x32xf32> to vector<8x32xf32>
    %18 = arith.addf %16, %17 : vector<8x32xf32>
    %c0_6 = arith.constant 0 : index
    %c0_7 = arith.constant 0 : index
    %19 = vector.load %arg3[%c0_6, %c0_7] : memref<8x32xf32, #tpu.memory_space<vmem>>, vector<8x32xf32>
    tpu.vector_store %arg3[%c0_6, %c0_7], %18 {strides = array<i32>} : memref<8x32xf32, #tpu.memory_space<vmem>>, vector<8x32xf32>,
    %c0_8 = arith.constant 0 : index
    %c0_9 = arith.constant 0 : index
    %20 = vector.load %arg4[%c0_8, %c0_9] : memref<8x32xf32, #tpu.memory_space<vmem>>, vector<8x32xf32>
    %21 = arith.mulf %15, %15 : vector<1x8x32xf32>
    %cst_10 = arith.constant dense<0.000000e+00> : vector<8x32xf32>
    %22 = vector.multi_reduction <add>, %21, %cst_10 [0] : vector<1x8x32xf32> to vector<8x32xf32>
    %23 = arith.addf %20, %22 : vector<8x32xf32>
    %c0_11 = arith.constant 0 : index
    %c0_12 = arith.constant 0 : index
    %24 = vector.load %arg4[%c0_11, %c0_12] : memref<8x32xf32, #tpu.memory_space<vmem>>, vector<8x32xf32>
    tpu.vector_store %arg4[%c0_11, %c0_12], %23 {strides = array<i32>} : memref<8x32xf32, #tpu.memory_space<vmem>>, vector<8x32xf32>,
    return
  }
  func.func @transform_0(%arg0: i32, %arg1: i32) -> (i32, i32) {
    %c1_i32 = arith.constant 1 : i32
    %0 = arith.muli %arg0, %c1_i32 : i32
    %1 = arith.addi %0, %arg1 : i32
    %c0_i32 = arith.constant 0 : i32
    %2 = arith.minsi %1, %c0_i32 : i32
    %c0_i32_0 = arith.constant 0 : i32
    %c0_i32_1 = arith.constant 0 : i32
    return %2, %c0_i32_0 : i32, i32
  }
  func.func @transform_1(%arg0: i32, %arg1: i32) -> (i32, i32) {
    %c0_i32 = arith.constant 0 : i32
    %c0_i32_0 = arith.constant 0 : i32
    return %arg0, %c0_i32 : i32, i32
  }
  func.func @transform_2(%arg0: i32, %arg1: i32) -> (i32, i32) {
    %c0_i32 = arith.constant 0 : i32
    %c0_i32_0 = arith.constant 0 : i32
    return %arg0, %c0_i32 : i32, i32
  }
}

</mosaic_0001>

<bundles_post_ra>
// kernel: tpu_custom_call.1
= control target key start
LH: loop header
LB: loop body
LE: loop exit
PB: predicated region body
PF: predicated region fallthrough
CT: control target
= control target key end

     0   :  { %8 = vsyncpa [#allocation3], 0  ;;  %s862_s0 = inlined_call_operand.hbm [shape: f32[8,32], index: 0, kind: input, shape index: {}]   ;;  %s863_s1 = inlined_call_operand.hbm [shape: f32[16,32], index: 1, kind: output, shape index: {0}]   ;;  %s864_s2 = inlined_call_operand.hbm [shape: f32[16,32], index: 2, kind: output, shape index: {1}]  }
   0x1   :  { %10 = vsyncpa [#allocation3 + $0x1], 0 }
   0x2   :  { %11 = vsyncpa [#allocation4], 0 }
   0x3   :  { %13 = vsyncpa [#allocation4 + $0x1], 0 }
   0x4   :  { %14 = vsyncpa [#allocation7], 0 }
   0x5   :  { %16 = vsyncpa [#allocation7 + $0x1], 0  ;;  %s659_s9 = smov 0   ;;  %s661_s10 = smov 0  }
   0x6   :  { %s663_s11 = smov 0   ;;  %s665_s12 = smov 0  }
   0x7   :  { %s667_s13 = smov 0   ;;  %s669_s14 = smov 0  }
   0x8   :  { %s671_s15 = smov 0   ;;  %s673_s16 = smov 0  }
   0x9 LB: > { %s364_s17 = sadd.s32 4294967295, %s638_s16   ;;  %s365_s18 = sadd.s32 4294967294, %s638_s16   ;;  %s638_s16 = sphi %s673_s16, %s22_s16   ;;  %s634_s15 = sphi %s671_s15, %s885_s15   ;;  %s630_s14 = sphi %s669_s14, %s884_s14   ;;  %s626_s13 = sphi %s667_s13, %s852_s13   ;;  %s622_s12 = sphi %s665_s12, %s883_s12   ;;  %s618_s11 = sphi %s663_s11, %s882_s11   ;;  %s614_s10 = sphi %s661_s10, %s881_s10   ;;  %s610_s9 = sphi %s659_s9, %s880_s9  }
   0xa   : > { %s34_s19 = sadd.s32 1, %s634_s15  ;;  %p607_p1 = scmp.ne.s32.totalorder %s626_s13, 0 }
   0xb   : > { %p36_p0 = scmp.ge.s32.totalorder %s34_s19, 2  ;;  %p55_p2 = scmp.eq.s32.totalorder %s638_s16, 0 }
   0xc   : > { %p60_p3 = scmp.ne.s32.totalorder %s626_s13, %s622_s12  ;;  %p61_p5 = scmp.eq.s32.totalorder %s364_s17, 0 }
   0xd   : > { %s887_s19 = smov (%p36_p0, %s34_s19), 0  ;;  %p705_p4 = por %p607_p1, %p55_p2 }
   0xe   : > { %p709_p6 = por %p61_p5, %p60_p3  ;;  %s70_s22 = ssub.s32 %s634_s15, %s887_s19 }
   0xf   : > { %p71_p7 = scmp.eq.s32.totalorder %s70_s22, 0  ;;  %s73_s23 = sadd.s32 1, %s618_s11 }
  0x10   : > { %s869_s21 = scalar_select %p709_p6, 1, 0 }
  0x11   : > { %s717_s24 = scalar_select %p71_p7, %s618_s11, %s73_s23  }
  0x12   : > { %p83_p8 = scmp.ne.s32.totalorder %s618_s11, %s614_s10  ;;  %p84_p9 = scmp.eq.s32.totalorder %s364_s17, 1 }
  0x13   : > { %p89_p10 = scmp.ne.s32.totalorder %s614_s10, %s610_s9  ;;  %p90_p11 = scmp.eq.s32.totalorder %s365_s18, 1 }
  0x14   : > { %p723_p12 = por %p84_p9, %p83_p8  ;;  %p398_p1 = scmp.lt.s32.totalorder %s638_s16, 2 }
  0x15   : > { %p728_p0 = por %p90_p11, %p89_p10  ;;  %s640_s27 = smov [#allocation2]  }
  0x16   : > { %s870_s25 = scalar_select %p723_p12, 1, 0 }
  0x17   : > { %s871_s26 = scalar_select %p728_p0, 1, 0 }
  0x18   : > { %s150_s28 = sshll.u32 %s640_s27, 4  ;;  %p735_p2 = pnand %p398_p1, %p705_p4  ;;  %s151_s28 = int_to_ptr.vmem [resolvable:$true] %s150_s28 }
  0x19   : > { %s473_s4 = scalar_lea.hbm %s862_s0, 128 }
  0x1a   : > { %s872_s29 = scalar_select %p735_p2, 1, 0 }
  0x1b   : > { %p474_p7 = scmp.ne.s32.totalorder %s862_s0, %s473_s4  ;;  %p475_p8 = pneg %p735_p2 }
  0x1c   : > { %p480_p4 = scmp.lt.u32.totalorder %s473_s4, %s473_s4  ;;  %p482_p11 = scmp.lt.u32.totalorder %s473_s4, %s862_s0 }
  0x1d   : > { %p476_p9 = pnand %p475_p8, %p474_p7 }
  0x1e   : > { %p483_p1 = por %p482_p11, %p480_p4 }
  0x1f   : > { %p477_p10 = pneg %p476_p9 }
  0x21   : > { %p484_p13 = pnand %p483_p1, %p477_p10 }
  0x23   : > { %487 = shalt.err (!%p484_p13)
}
  0x24   : > { %s488_s12 = scalar_lea.vmem %s151_s28, 128  ;;  %s495_s17 = scalar_lea.vmem %s151_s28, 256 }
  0x25   : > { %p489_p3 = scmp.ne.s32.totalorder %s151_s28, %s488_s12  ;;  %p496_p12 = scmp.lt.s32.totalorder %s151_s28, %s151_s28 }
  0x26   : > { %p497_p6 = scmp.lt.s32.totalorder %s495_s17, %s488_s12 }
  0x27   : > { %p491_p5 = pnand %p489_p3, %p475_p8 }
  0x28   : > { %p498_p2 = por %p497_p6, %p496_p12 }
  0x29   : > { %p492_p0 = pneg %p491_p5 }
  0x2b   : > { %p499_p7 = pnand %p498_p2, %p492_p0 }
  0x2d   : > { %502 = shalt.err (!%p499_p7)
}
  0x2e   : > { %p873_p9 = scmp.ne.s32.totalorder %s872_s29, 0  ;;  %p874_p10 = scmp.lt.s32.totalorder %s638_s16, 3 }
  0x2f   : > { %p875_p13 = scmp.ge.s32.totalorder %s638_s16, 1 }
  0x30   : > { %390 = dma.hbm_to_vmem [thread:$0]  (!%p873_p9), %s862_s0, 128, %s151_s28, [#allocation3]  }
  0x31   : > { %p156_p4 = pnand %p875_p13, %p874_p10 }
  0x32   : > { %s161_s22 = sand.u32 (!%p156_p4), 1, %s626_s13   ;;  %p876_p6 = scmp.ne.s32.totalorder (!%p156_p4), %s869_s21, 0 }
  0x33   : > { %159 = sbr.rel (%p156_p4) target bundleno = 111 (0x6f), region = 24  ;;  %s371_s23 = sshll.u32 (!%p156_p4), %s161_s22, 3 }
  0x34   : > { %s162_s27 = scalar_lea.sflag (!%p156_p4), [#allocation3], %s161_s22  ;;  %s165_s30 = scalar_lea.vmem (!%p156_p4), [#allocation2], %s371_s23 }
  0x3a   : > { %596 = dma.done.wait (%p876_p6), %s162_s27, 128  }
  0x3b   : > { %598 = vsyncadd (%p876_p6), %s162_s27, 4294967168  ;;  %s767_s29 = sand.u32 1, %s614_s10   ;;  %vm198_vm0 = vcmask 261120   ;;  %s374_s28 = sshll.u32 %s630_s14, 3  ;;  %v205_v0 = vlaneseq  ;;  %v641_v3 = vmov 0.0   ;;  %v201_v4 = vld [vmem:[%s165_s30] sm:$0xff] }
  0x3c   : > { %s372_s3 = sshll.u32 %s767_s29, 3  ;;  %s204_s4 = ssub.s32 8, %s374_s28 }
  0x3d   : > { %v206_v1 = vshrl.u32 %v205_v0, 7  ;;  %v207_v2 = vstv %s204_s4  ;;  %s183_s5 = scalar_lea.vmem [#allocation5], %s372_s3  ;;  %s190_s6 = scalar_lea.vmem [#allocation6], %s372_s3 }
  0x3e   : > { %199 = vst.msk [vmem:[%s183_s5] sm:$0xff] %vm198_vm0, %v641_v3  ;;  %200 = vst.msk [vmem:[%s190_s6] sm:$0xff] %vm198_vm0, %v641_v3  ;;  %s377_s21 = sshll.u32 %s630_s14, 7  ;;  %s241_s7 = sshll.u32 %s183_s5, 4  ;;  %s779_s7 = int_to_ptr.vmem [resolvable:$true] %s241_s7 }
  0x3f   : > { %vm208_vm1 = vcmp.lt.s32.totalorder %v206_v1, %v207_v2  ;;  %s254_s8 = sshll.u32 %s190_s6, 4  ;;  %s777_s18 = scalar_lea.hbm %s863_s1, %s377_s21  ;;  %s786_s8 = int_to_ptr.vmem [resolvable:$true] %s254_s8 }
  0x40   : > { %v211_v5 = vsel %vm208_vm1, %v201_v4, 0.0  ;;  %s784_s14 = scalar_lea.hbm %s864_s2, %s377_s21  ;;  %s223_s23 = scalar_lea.sflag [#allocation4], %s767_s29 }
  0x41   : > { %v218_v6 = vmul.f32 %v211_v5, %v211_v5  ;;  %s503_s27 = scalar_lea.vmem %s779_s7, 128  ;;  %p877_p0 = scmp.ne.s32.totalorder %s870_s25, 0 }
  0x42   : > { %p504_p12 = scmp.ne.s32.totalorder %s779_s7, %s503_s27  ;;  %s642_s30 = smov [#allocation5]  }
  0x43   : > { %s507_s28 = sshll.u32 %s642_s30, 4  ;;  %s508_s28 = int_to_ptr.vmem [resolvable:$false] %s507_s28 }
  0x44   : > { %p505_p2 = pnand %p504_p12, %p877_p0  ;;  %s509_s3 = scalar_lea.vmem %s508_s28, 256 }
  0x45   : > { %v212_v7 = vld [vmem:[%s183_s5] sm:$0xff]  ;;  %v217_v8 = vld [vmem:[%s190_s6] sm:$0xff]  ;;  %p510_p5 = scmp.lt.s32.totalorder %s779_s7, %s508_s28  ;;  %p511_p8 = scmp.lt.s32.totalorder %s509_s3, %s503_s27 }
  0x46   : > { %v214_v9 = vadd.f32 %v212_v7, %v211_v5  ;;  %v220_v10 = vadd.f32 %v218_v6, %v217_v8  ;;  %p506_p3 = pneg %p505_p2 }
  0x47   : > { %p512_p11 = por %p511_p8, %p510_p5 }
  0x48   : > { %216 = vst.msk [vmem:[%s183_s5] sm:$0xff] %vm198_vm0, %v214_v9  ;;  %221 = vst.msk [vmem:[%s190_s6] sm:$0xff] %vm198_vm0, %v220_v10 }
  0x49   : > { %p513_p1 = pnand %p512_p11, %p506_p3 }
  0x4b   : > { %516 = shalt.err (!%p513_p1)
}
  0x4c   : > { %s517_s4 = scalar_lea.hbm %s777_s18, 128  ;;  %s521_s21 = scalar_lea.hbm %s863_s1, 256 }
  0x4d   : > { %p518_p7 = scmp.ne.s32.totalorder %s777_s18, %s517_s4  ;;  %p522_p13 = scmp.lt.u32.totalorder %s777_s18, %s863_s1 }
  0x4e   : > { %p523_p4 = scmp.lt.u32.totalorder %s521_s21, %s517_s4  ;;  %p525_p12 = scmp.lt.u32.totalorder %s517_s4, %s777_s18 }
  0x4f   : > { %p519_p9 = pnand %p518_p7, %p877_p0 }
  0x50   : > { %p524_p6 = por %p523_p4, %p522_p13 }
  0x51   : > { %p520_p10 = pneg %p519_p9 }
  0x52   : > { %p526_p2 = por %p525_p12, %p524_p6 }
  0x54   : > { %p527_p3 = pnand %p526_p2, %p520_p10 }
  0x56   : > { %530 = shalt.err (!%p527_p3)
}
  0x57   : > { %383 = dma.vmem_to_hbm [thread:$0]  (%p877_p0), %s779_s7, 128, %s777_s18, %s223_s23  }
  0x58   : > { %s228_s20 = scalar_lea.sflag [#allocation7], %s767_s29  ;;  %s531_s22 = scalar_lea.vmem %s786_s8, 128 }
  0x59   : > { %p532_p5 = scmp.ne.s32.totalorder %s786_s8, %s531_s22  ;;  %s643_s27 = smov [#allocation6]  }
  0x5a   : > { %s535_s30 = sshll.u32 %s643_s27, 4  ;;  %s536_s30 = int_to_ptr.vmem [resolvable:$false] %s535_s30 }
  0x5b   : > { %p533_p8 = pnand %p532_p5, %p877_p0  ;;  %s537_s28 = scalar_lea.vmem %s536_s30, 256 }
  0x5c   : > { %p538_p1 = scmp.lt.s32.totalorder %s786_s8, %s536_s30  ;;  %p539_p7 = scmp.lt.s32.totalorder %s537_s28, %s531_s22 }
  0x5d   : > { %p534_p11 = pneg %p533_p8 }
  0x5e   : > { %p540_p9 = por %p539_p7, %p538_p1 }
  0x60   : > { %p541_p10 = pnand %p540_p9, %p534_p11 }
  0x62   : > { %544 = shalt.err (!%p541_p10)
}
  0x63   : > { %s545_s29 = scalar_lea.hbm %s784_s14, 128  ;;  %s549_s23 = scalar_lea.hbm %s864_s2, 256 }
  0x64   : > { %p546_p13 = scmp.ne.s32.totalorder %s784_s14, %s545_s29  ;;  %p550_p12 = scmp.lt.u32.totalorder %s784_s14, %s864_s2 }
  0x65   : > { %p551_p2 = scmp.lt.u32.totalorder %s549_s23, %s545_s29  ;;  %p553_p5 = scmp.lt.u32.totalorder %s545_s29, %s784_s14 }
  0x66   : > { %p547_p4 = pnand %p546_p13, %p877_p0 }
  0x67   : > { %p552_p3 = por %p551_p2, %p550_p12 }
  0x68   : > { %p548_p6 = pneg %p547_p4 }
  0x69   : > { %p554_p8 = por %p553_p5, %p552_p3 }
  0x6b   : > { %p555_p11 = pnand %p554_p8, %p548_p6 }
  0x6d   : > { %558 = shalt.err (!%p555_p11)
}
  0x6e   : > { %384 = dma.vmem_to_hbm [thread:$0]  (%p877_p0), %s786_s8, 128, %s784_s14, %s228_s20  }
  0x6f PF: > { %s266_s5 = sand.u32 1, %s610_s9   ;;  %p878_p1 = scmp.ne.s32.totalorder %s871_s26, 0 }
  0x70   : > { %p879_p7 = scmp.ge.s32.totalorder %s638_s16, 2  ;;  %s267_s6 = scalar_lea.sflag [#allocation4], %s266_s5 }
  0x72   : > { %p392_p9 = pnand %p879_p7, %p878_p1 }
  0x74   : > { %600 = dma.done.wait (!%p392_p9), %s267_s6, 128  }
  0x75   : > { %602 = vsyncadd (!%p392_p9), %s267_s6, 4294967168  ;;  %s276_s21 = scalar_lea.sflag [#allocation7], %s266_s5 }
  0x76   : > { %604 = dma.done.wait (!%p392_p9), %s276_s21, 128  }
  0x77   : > { %606 = vsyncadd (!%p392_p9), %s276_s21, 4294967168  ;;  %s22_s16 = sadd.s32 1, %s638_s16   ;;  %s880_s9 = smov %s614_s10 }
  0x78   : > { %p19_p10 = scmp.ge.s32.totalorder %s22_s16, 4   ;;  %s881_s10 = smov %s618_s11 }
  0x79   : > { %s882_s11 = smov %s717_s24  ;;  %s883_s12 = smov %s626_s13 }
  0x7a   : > { %s852_s13 = smov 0   ;;  %s884_s14 = smov %s634_s15 }
  0x7b   : > { %s885_s15 = smov %s887_s19  ;;  %21 = sbr.rel (!%p19_p10) target bundleno = 9 (0x9), region = 90 }
  0x82   :  { %281 = vsyncpa [#allocation3], 1 }
  0x83   :  { %283 = vsyncpa [#allocation3 + $0x1], 1 }
  0x84   :  { %284 = vsyncpa [#allocation4], 1 }
  0x85   :  { %286 = vsyncpa [#allocation4 + $0x1], 1 }
  0x86   :  { %287 = vsyncpa [#allocation7], 1 }
  0x87   :  { %289 = vsyncpa [#allocation7 + $0x1], 1 }

</bundles_post_ra>
